<compile_context>
chip_gen: v6e
topology: v6e:2x2x1
jax: 0.10.0
libtpu: 0.0.40
codegen_flags: <defaults>
</compile_context>

<pallas_src>
import jax
import jax.numpy as jnp
from jax.experimental import pallas as pl
from jax.experimental.pallas import tpu as pltpu

_LANES = 128


def _round_up(n, m):
    return ((n + m - 1) // m) * m


def value_network_kernel(x_ref, w1_ref, b1_ref, w2_ref, b2_ref,
                         wh_ref, bh_ref, out_ref):
    """One batch tile: packed body MLP (2x Linear+ReLU) + scalar value head.

    x_ref  : (tile_g, PACK*in_dim)   caller dtype (cast to bf16 in-kernel)
    w1_ref : (PACK*in_dim, PACK*hidden)  bf16 block-diagonal
    b1_ref : (1, PACK*hidden)            f32
    w2_ref : (PACK*hidden, PACK*hidden)  bf16 block-diagonal
    b2_ref : (1, PACK*hidden)            f32
    wh_ref : (PACK*hidden, PACK)         bf16 block-diagonal head weight
    bh_ref : (1,) f32 in SMEM            scalar head bias
    out_ref: (tile_g, PACK) f32          PACK packed value outputs per row
    """
    # In-kernel bf16 cast (avoids a separate full-HBM-pass astype in the wrapper).
    x = x_ref[...].astype(jnp.bfloat16)

    # Body layer 1: lane-dense packed matmul, f32 accumulation, bias + ReLU in f32.
    h1 = jnp.dot(x, w1_ref[...], preferred_element_type=jnp.float32) + b1_ref[...]
    h1 = jnp.maximum(h1, 0.0).astype(jnp.bfloat16)

    # Body layer 2 (== body_network.layers[-2] in the PyTorch module).
    h2 = jnp.dot(h1, w2_ref[...], preferred_element_type=jnp.float32) + b2_ref[...]
    h2 = jnp.maximum(h2, 0.0).astype(jnp.bfloat16)

    # Value head Linear(hidden, 1), block-diagonal packed: (tile_g, P*H) @ (P*H, P).
    v = jnp.dot(h2, wh_ref[...], preferred_element_type=jnp.float32)
    out_ref[...] = v + bh_ref[0]


def value_network_forward(x, w1, b1, w2, b2, w_head, b_head, *,
                          vmem_budget_bytes=24 * 1024 * 1024,
                          max_tile_rows=None):
    """value = head(body(x)) with body = ReLU(ReLU(x@W1+b1)@W2+b2)."""
    B, in_dim = x.shape
    hidden = w1.shape[1]

    # ---- row packing: PACK batch rows per lane-dense 128-wide row ----------
    pack = _LANES // in_dim if (in_dim <= _LANES and _LANES % in_dim == 0) else 1

    b_pack = _round_up(B, pack)
    if b_pack != B:
        # TODO(synk): ragged B % pack tail costs one extra copy of x; keep B % pack == 0.
        x = jnp.pad(x, ((0, b_pack - B), (0, 0)))
    num_groups = b_pack // pack
    xg = x.reshape(num_groups, pack * in_dim)   # free row-major reshape, batch on lanes

    # ---- tiny packed (block-diagonal) weights; bf16 MXU operands -----------
    eye = jnp.eye(pack, dtype=jnp.float32)
    w1p = jnp.kron(eye, w1.astype(jnp.float32)).astype(jnp.bfloat16)
    w2p = jnp.kron(eye, w2.astype(jnp.float32)).astype(jnp.bfloat16)
    whp = jnp.kron(eye, w_head.reshape(hidden, 1).astype(jnp.float32)).astype(jnp.bfloat16)
    b1p = jnp.tile(b1.reshape(1, hidden).astype(jnp.float32), (1, pack))
    b2p = jnp.tile(b2.reshape(1, hidden).astype(jnp.float32), (1, pack))
    bh = b_head.reshape(1).astype(jnp.float32)      # scalar -> SMEM

    # ---- tile size derived from a VMEM byte budget --------------------------
    x_itemsize = jnp.dtype(x.dtype).itemsize
    per_group_bytes = (
        2 * pack * in_dim * x_itemsize       # x tile, double-buffered (lane-dense)
        + 2 * _LANES * 4                     # out tile, double-buffered (pack -> 128 lane pad)
        + pack * in_dim * 2                  # in-kernel x bf16 copy
        + 2 * pack * hidden * (4 + 2)        # h1 / h2 in f32 + bf16
        + _LANES * 4                         # head result before store
    )
    weight_bytes = (2 * 2 * (w1p.size + w2p.size + whp.size)
                    + 2 * 4 * (b1p.size + b2p.size))
    budget = max(vmem_budget_bytes - weight_bytes, per_group_bytes)
    tile_g = max(8, int(budget // per_group_bytes) // 8 * 8)
    if max_tile_rows is not None:            # testing hook: cap tile in batch rows
        tile_g = max(8, min(tile_g, (max_tile_rows // pack) // 8 * 8))
    if num_groups > 16:
        # keep >= 2 grid steps so "parallel" can shard tiles across TensorCores
        tile_g = min(tile_g, _round_up(pl.cdiv(num_groups, 2), 8))
    if tile_g >= num_groups:
        tile_g = num_groups                  # single full-extent block
    num_tiles = pl.cdiv(num_groups, tile_g)  # ragged last tile handled by Pallas

    flops = 2 * b_pack * (in_dim * hidden + hidden * hidden + hidden)
    bytes_accessed = (int(xg.size) * x_itemsize + b_pack * 4
                      + 2 * int(w1p.size + w2p.size + whp.size)
                      + 4 * int(b1p.size + b2p.size + bh.size))

    out = pl.pallas_call(
        value_network_kernel,
        out_shape=jax.ShapeDtypeStruct((num_groups, pack), jnp.float32),
        grid_spec=pltpu.PrefetchScalarGridSpec(
            num_scalar_prefetch=0,
            grid=(num_tiles,),
            in_specs=[
                pl.BlockSpec((tile_g, pack * in_dim), lambda i: (i, 0)),          # x (streams)
                pl.BlockSpec((pack * in_dim, pack * hidden), lambda i: (0, 0)),   # W1p (resident)
                pl.BlockSpec((1, pack * hidden), lambda i: (0, 0)),               # b1p (resident)
                pl.BlockSpec((pack * hidden, pack * hidden), lambda i: (0, 0)),   # W2p (resident)
                pl.BlockSpec((1, pack * hidden), lambda i: (0, 0)),               # b2p (resident)
                pl.BlockSpec((pack * hidden, pack), lambda i: (0, 0)),            # W_head packed
                pl.BlockSpec(memory_space=pltpu.MemorySpace.SMEM),                # b_head scalar
            ],
            out_specs=pl.BlockSpec((tile_g, pack), lambda i: (i, 0)),
        ),
        compiler_params=pltpu.CompilerParams(
            dimension_semantics=("parallel",),          # shard tiles across v7x TCs
            vmem_limit_bytes=48 * 1024 * 1024),         # < 64 MiB physical on v7x
        cost_estimate=pl.CostEstimate(
            flops=int(flops), transcendentals=0,
            bytes_accessed=int(bytes_accessed)),
    )(xg, w1p, b1p, w2p, b2p, whp, bh)

    # (num_groups, pack) row-major == per-batch-row values; drop pad, -> (B, 1).
    return out.reshape(-1)[:B].reshape(B, 1)


if __name__ == "__main__":
    B, IN_DIM, HIDDEN = 200, 16, 32

    key = jax.random.PRNGKey(0)
    kx, k1, k2, k3, k4, k5, k6 = jax.random.split(key, 7)
    x = jax.random.normal(kx, (B, IN_DIM), dtype=jnp.float32)

    def init_linear(kw, kb, fan_in, fan_out):
        bound = 1.0 / float(fan_in) ** 0.5
        w = jax.random.uniform(kw, (fan_in, fan_out), jnp.float32, -bound, bound)
        b = jax.random.uniform(kb, (fan_out,), jnp.float32, -bound, bound)
        return w, b

    w1, b1 = init_linear(k1, k2, IN_DIM, HIDDEN)
    w2, b2 = init_linear(k3, k4, HIDDEN, HIDDEN)
    wh, bh = init_linear(k5, k6, HIDDEN, 1)     # (HIDDEN, 1), (1,)

    def reference_f32(xv):
        h1 = jnp.maximum(xv @ w1 + b1, 0.0)
        h2 = jnp.maximum(h1 @ w2 + b2, 0.0)
        return h2 @ wh + bh

    def reference_mixed(xv):
        # Same precision recipe as the kernel: bf16 matmul operands, f32 accumulate.
        xb = xv.astype(jnp.bfloat16)
        h1 = jnp.dot(xb, w1.astype(jnp.bfloat16), preferred_element_type=jnp.float32) + b1
        h1 = jnp.maximum(h1, 0.0).astype(jnp.bfloat16)
        h2 = jnp.dot(h1, w2.astype(jnp.bfloat16), preferred_element_type=jnp.float32) + b2
        h2 = jnp.maximum(h2, 0.0).astype(jnp.bfloat16)
        return jnp.dot(h2, wh.astype(jnp.bfloat16), preferred_element_type=jnp.float32) + bh

    ref_mixed = reference_mixed(x)
    ref_f32 = reference_f32(x)

    fwd = jax.jit(value_network_forward,
                  static_argnames=("vmem_budget_bytes", "max_tile_rows"))

    # Default: VMEM-budget tile (capped to 2 grid steps at this small batch).
    # max_tile_rows=64: forces 4 grid steps including a ragged last tile.
    for kwargs in ({}, {"max_tile_rows": 64}):
        out = fwd(x, w1, b1, w2, b2, wh, bh, **kwargs)
        out = jax.block_until_ready(out)
        assert out.shape == (B, 1), out.shape
        assert jnp.allclose(out, ref_mixed, atol=5e-3, rtol=5e-3), \
            f"mismatch vs mixed-precision reference ({kwargs})"
        assert jnp.allclose(out, ref_f32, atol=5e-2, rtol=5e-2), \
            f"mismatch vs f32 reference ({kwargs})"

    print("KERNEL_OK")
</pallas_src>

<mosaic_0001>
module attributes {stable_mosaic.version = 11 : i64} {
  func.func @value_network_kernel(%arg0: i32, %arg1: memref<16x128xf32, #tpu.memory_space<vmem>>, %arg2: memref<128x256xbf16, #tpu.memory_space<vmem>>, %arg3: memref<1x256xf32, #tpu.memory_space<vmem>>, %arg4: memref<256x256xbf16, #tpu.memory_space<vmem>>, %arg5: memref<1x256xf32, #tpu.memory_space<vmem>>, %arg6: memref<256x8xbf16, #tpu.memory_space<vmem>>, %arg7: memref<1xf32, #tpu.memory_space<smem>>, %arg8: memref<16x8xf32, #tpu.memory_space<vmem>>) attributes {dimension_semantics = [#tpu.dimension_semantics<parallel>], iteration_bounds = array<i64: 2>, scalar_prefetch = 0 : i64, scratch_operands = 0 : i64, tpu.core_type = #tpu.core_type<tc>, window_params = [{transform_indices = @transform_0, window_bounds = array<i64: 16, 128>}, {pipeline_mode = #tpu.pipeline_mode<synchronous>, transform_indices = @transform_1, window_bounds = array<i64: 128, 256>}, {pipeline_mode = #tpu.pipeline_mode<synchronous>, transform_indices = @transform_2, window_bounds = array<i64: 1, 256>}, {pipeline_mode = #tpu.pipeline_mode<synchronous>, transform_indices = @transform_3, window_bounds = array<i64: 256, 256>}, {pipeline_mode = #tpu.pipeline_mode<synchronous>, transform_indices = @transform_4, window_bounds = array<i64: 1, 256>}, {pipeline_mode = #tpu.pipeline_mode<synchronous>, transform_indices = @transform_5, window_bounds = array<i64: 256, 8>}, {transform_indices = @transform_6, window_bounds = array<i64: 1>}, {transform_indices = @transform_7, window_bounds = array<i64: 16, 8>}]} {
    %c0 = arith.constant 0 : index
    %c0_0 = arith.constant 0 : index
    %0 = vector.load %arg1[%c0, %c0_0] : memref<16x128xf32, #tpu.memory_space<vmem>>, vector<16x128xf32>
    %1 = arith.truncf %0 : vector<16x128xf32> to vector<16x128xbf16>
    %c0_1 = arith.constant 0 : index
    %c0_2 = arith.constant 0 : index
    %2 = vector.load %arg2[%c0_1, %c0_2] : memref<128x256xbf16, #tpu.memory_space<vmem>>, vector<128x256xbf16>
    %cst = arith.constant dense<0.000000e+00> : vector<16x256xf32>
    %3 = tpu.matmul %1, %2, %cst {dimension_numbers = #tpu.dot_dimension_numbers<[1], [0], [0], [1], [0, 0, 1, 1], [], []>} : vector<16x128xbf16>, vector<128x256xbf16>, vector<16x256xf32> -> vector<16x256xf32>
    %c0_3 = arith.constant 0 : index
    %c0_4 = arith.constant 0 : index
    %4 = vector.load %arg3[%c0_3, %c0_4] : memref<1x256xf32, #tpu.memory_space<vmem>>, vector<1x256xf32>
    %5 = vector.broadcast %4 : vector<1x256xf32> to vector<16x256xf32>
    %6 = arith.addf %3, %5 : vector<16x256xf32>
    %cst_5 = arith.constant 0.000000e+00 : f32
    %7 = vector.broadcast %cst_5 : f32 to vector<16x256xf32>
    %8 = arith.maximumf %6, %7 : vector<16x256xf32>
    %9 = arith.truncf %8 : vector<16x256xf32> to vector<16x256xbf16>
    %c0_6 = arith.constant 0 : index
    %c0_7 = arith.constant 0 : index
    %10 = vector.load %arg4[%c0_6, %c0_7] : memref<256x256xbf16, #tpu.memory_space<vmem>>, vector<256x256xbf16>
    %cst_8 = arith.constant dense<0.000000e+00> : vector<16x256xf32>
    %11 = tpu.matmul %9, %10, %cst_8 {dimension_numbers = #tpu.dot_dimension_numbers<[1], [0], [0], [1], [0, 0, 1, 1], [], []>} : vector<16x256xbf16>, vector<256x256xbf16>, vector<16x256xf32> -> vector<16x256xf32>
    %c0_9 = arith.constant 0 : index
    %c0_10 = arith.constant 0 : index
    %12 = vector.load %arg5[%c0_9, %c0_10] : memref<1x256xf32, #tpu.memory_space<vmem>>, vector<1x256xf32>
    %13 = vector.broadcast %12 : vector<1x256xf32> to vector<16x256xf32>
    %14 = arith.addf %11, %13 : vector<16x256xf32>
    %cst_11 = arith.constant 0.000000e+00 : f32
    %15 = vector.broadcast %cst_11 : f32 to vector<16x256xf32>
    %16 = arith.maximumf %14, %15 : vector<16x256xf32>
    %17 = arith.truncf %16 : vector<16x256xf32> to vector<16x256xbf16>
    %c0_12 = arith.constant 0 : index
    %c0_13 = arith.constant 0 : index
    %18 = vector.load %arg6[%c0_12, %c0_13] : memref<256x8xbf16, #tpu.memory_space<vmem>>, vector<256x8xbf16>
    %cst_14 = arith.constant dense<0.000000e+00> : vector<16x8xf32>
    %19 = tpu.matmul %17, %18, %cst_14 {dimension_numbers = #tpu.dot_dimension_numbers<[1], [0], [0], [1], [0, 0, 1, 1], [], []>} : vector<16x256xbf16>, vector<256x8xbf16>, vector<16x8xf32> -> vector<16x8xf32>
    %c0_15 = arith.constant 0 : index
    %20 = memref.load %arg7[%c0_15] : memref<1xf32, #tpu.memory_space<smem>>
    %21 = vector.broadcast %20 : f32 to vector<16x8xf32>
    %22 = arith.addf %19, %21 : vector<16x8xf32>
    %c0_16 = arith.constant 0 : index
    %c0_17 = arith.constant 0 : index
    %23 = vector.load %arg8[%c0_16, %c0_17] : memref<16x8xf32, #tpu.memory_space<vmem>>, vector<16x8xf32>
    tpu.vector_store %arg8[%c0_16, %c0_17], %22 {strides = array<i32>} : memref<16x8xf32, #tpu.memory_space<vmem>>, vector<16x8xf32>,
    return
  }
  func.func @transform_0(%arg0: i32) -> (i32, i32) {
    %c0_i32 = arith.constant 0 : i32
    %c0_i32_0 = arith.constant 0 : i32
    return %arg0, %c0_i32 : i32, i32
  }
  func.func @transform_1(%arg0: i32) -> (i32, i32) {
    %c0_i32 = arith.constant 0 : i32
    %c0_i32_0 = arith.constant 0 : i32
    %c0_i32_1 = arith.constant 0 : i32
    return %c0_i32, %c0_i32_0 : i32, i32
  }
  func.func @transform_2(%arg0: i32) -> (i32, i32) {
    %c0_i32 = arith.constant 0 : i32
    %c0_i32_0 = arith.constant 0 : i32
    %c0_i32_1 = arith.constant 0 : i32
    return %c0_i32, %c0_i32_0 : i32, i32
  }
  func.func @transform_3(%arg0: i32) -> (i32, i32) {
    %c0_i32 = arith.constant 0 : i32
    %c0_i32_0 = arith.constant 0 : i32
    %c0_i32_1 = arith.constant 0 : i32
    return %c0_i32, %c0_i32_0 : i32, i32
  }
  func.func @transform_4(%arg0: i32) -> (i32, i32) {
    %c0_i32 = arith.constant 0 : i32
    %c0_i32_0 = arith.constant 0 : i32
    %c0_i32_1 = arith.constant 0 : i32
    return %c0_i32, %c0_i32_0 : i32, i32
  }
  func.func @transform_5(%arg0: i32) -> (i32, i32) {
    %c0_i32 = arith.constant 0 : i32
    %c0_i32_0 = arith.constant 0 : i32
    %c0_i32_1 = arith.constant 0 : i32
    return %c0_i32, %c0_i32_0 : i32, i32
  }
  func.func @transform_6(%arg0: i32) -> i32 {
    %c0_i32 = arith.constant 0 : i32
    %c0_i32_0 = arith.constant 0 : i32
    return %c0_i32 : i32
  }
  func.func @transform_7(%arg0: i32) -> (i32, i32) {
    %c0_i32 = arith.constant 0 : i32
    %c0_i32_0 = arith.constant 0 : i32
    return %arg0, %c0_i32 : i32, i32
  }
}

</mosaic_0001>

<bundles_post_ra>
// kernel: value_network_forward.1
= control target key start
LH: loop header
LB: loop body
LE: loop exit
PB: predicated region body
PF: predicated region fallthrough
CT: control target
= control target key end

     0   :  { %s1173_s26 = smov 0   ;;  %s1395_s0 = inlined_call_operand.vmem [shape: f32[25,128], index: 0, kind: input, shape index: {}]   ;;  %s1396_s1 = inlined_call_operand.vmem [shape: bf16[128,256], index: 1, kind: input, shape index: {}]   ;;  %s1397_s2 = inlined_call_operand.vmem [shape: f32[1,256], index: 2, kind: input, shape index: {}]   ;;  %s1398_s3 = inlined_call_operand.vmem [shape: bf16[256,256], index: 3, kind: input, shape index: {}]   ;;  %s1399_s4 = inlined_call_operand.vmem [shape: f32[1,256], index: 4, kind: input, shape index: {}]   ;;  %s1400_s5 = inlined_call_operand.vmem [shape: bf16[256,8], index: 5, kind: input, shape index: {}]   ;;  %s1401_s6 = inlined_call_operand.<no memory space> [shape: f32[1], index: 6, kind: input, shape index: {}]   ;;  %s1402_s7 = inlined_call_operand.vmem [shape: f32[25,8], index: 7, kind: output, shape index: {}]  }
   0x1   :  { %12 = sst [smem:[#allocation2]] %s1401_s6 }
   0x2 LB: > { %s927_s27 = sadd.s32 4294967295, %s1127_s26   ;;  %p931_p0 = scmp.ge.s32.totalorder %s1127_s26, 1  ;;  %s1127_s26 = sphi %s1173_s26, %s18_s26  }
   0x3   : > { %p239_p1 = scmp.lt.s32.totalorder %s1127_s26, 3 }
   0x5   : > { %p240_p2 = pnand %p931_p0, %p239_p1 }
   0x6   : > { %s932_s18 = sshll.u32 (!%p240_p2), %s927_s27, 1  ;;  %s729_s12 = sld [smem:[#allocation2]] (!%p240_p2) }
   0x7   : > { %243 = sbr.rel (%p240_p2) target bundleno = 661 (0x295), region = 48  ;;  %p272_p3 = scmp.lt.s32.totalorder (!%p240_p2), %s932_s18, 3 }
   0xc   : > { %v1033_v0 = vld [vmem:[%s1396_s1 + $0x74] ss:$8 sps:$4 sm:$0xff]   ;;  %v1035_v1 = vld [vmem:[%s1396_s1 + $0x70] ss:$8 sps:$4 sm:$0xff]   ;;  %v1129_v2 = vmov 0   ;;  %s1404_s18 = smov (!%p272_p3, %s932_s18), 3  ;;  %v305_v62 = vlaneseq }
   0xd   : > { %427 = vmatprep.mubr.bf16.mxu0 %v1129_v2  ;;  %395 = vmatprep.subr.bf16.mxu0 %v1033_v0  ;;  %v1036_v3 = vld [vmem:[%s1396_s1 + $0x64] ss:$8 sps:$4 sm:$0xff]   ;;  %v1038_v4 = vld [vmem:[%s1396_s1 + $0x60] ss:$8 sps:$4 sm:$0xff]   ;;  %v1039_v5 = vld [vmem:[%s1396_s1 + $0x54] ss:$8 sps:$4 sm:$0xff]  }
   0xe   : > { %396 = vmatpush1.bf16.msra.mxu0 %v1035_v1  ;;  %v1041_v6 = vld [vmem:[%s1396_s1 + $0x50] ss:$8 sps:$4 sm:$0xff]   ;;  %v1042_v7 = vld [vmem:[%s1396_s1 + $0x44] ss:$8 sps:$4 sm:$0xff]   ;;  %v1044_v8 = vld [vmem:[%s1396_s1 + $0x40] ss:$8 sps:$4 sm:$0xff]  }
   0xf   : > { %397 = vmatprep.subr.bf16.mxu0 %v1036_v3  ;;  %v1045_v9 = vld [vmem:[%s1396_s1 + $0x34] ss:$8 sps:$4 sm:$0xff]   ;;  %v1059_v11 = vld [vmem:[%s1398_s3 + $0x70] ss:$8 sps:$4 sm:$0xff]   ;;  %v1060_v12 = vld [vmem:[%s1398_s3 + $0x64] ss:$8 sps:$4 sm:$0xff]  }
  0x10   : > { %v1057_v10 = vld [vmem:[%s1398_s3 + $0x74] ss:$8 sps:$4 sm:$0xff]   ;;  %v1047_v13 = vld [vmem:[%s1396_s1 + $0x30] ss:$8 sps:$4 sm:$0xff]   ;;  %v1062_v14 = vld [vmem:[%s1398_s3 + $0x60] ss:$8 sps:$4 sm:$0xff]  }
  0x11   : > { %648 = vmatprep.subr.bf16.mxu1 %v1057_v10  ;;  %v1048_v15 = vld [vmem:[%s1396_s1 + $0x24] ss:$8 sps:$4 sm:$0xff]   ;;  %v1063_v16 = vld [vmem:[%s1398_s3 + $0x54] ss:$8 sps:$4 sm:$0xff]   ;;  %v1050_v17 = vld [vmem:[%s1396_s1 + $0x20] ss:$8 sps:$4 sm:$0xff]  }
  0x12   : > { %398 = vmatpush1.bf16.msra.mxu0 %v1038_v4  ;;  %649 = vmatpush1.bf16.msra.mxu1 %v1059_v11  ;;  %s933_s16 = sshll.u32 %s1404_s18, 3  ;;  %v1065_v18 = vld [vmem:[%s1398_s3 + $0x50] ss:$8 sps:$4 sm:$0xff]   ;;  %v1051_v19 = vld [vmem:[%s1396_s1 + $0x14] ss:$8 sps:$4 sm:$0xff]   ;;  %v1109_v56 = vld [vmem:[%s1400_s5 + $0x68] sm:$0xff]  }
  0x13   : > { %399 = vmatprep.subr.bf16.mxu0 %v1039_v5  ;;  %650 = vmatprep.subr.bf16.mxu1 %v1060_v12  ;;  %v1066_v20 = vld [vmem:[%s1398_s3 + $0x44] ss:$8 sps:$4 sm:$0xff]   ;;  %v1053_v21 = vld [vmem:[%s1396_s1 + $0x10] ss:$8 sps:$4 sm:$0xff]   ;;  %s275_s29 = scalar_lea.vmem %s1395_s0, %s933_s16  ;;  %v1068_v22 = vld [vmem:[%s1398_s3 + $0x40] ss:$8 sps:$4 sm:$0xff]   ;;  %s281_s15 = scalar_lea.vmem %s1402_s7, %s933_s16 }
  0x14   : > { %v1054_v23 = vld [vmem:[%s1396_s1 + $0x4] ss:$8 sps:$4 sm:$0xff]   ;;  %v1069_v24 = vld [vmem:[%s1398_s3 + $0x34] ss:$8 sps:$4 sm:$0xff]   ;;  %v1056_v25 = vld [vmem:[%s1396_s1] ss:$8 sps:$4 sm:$0xff]  }
  0x15   : > { %v284_v26 = vld [vmem:[%s275_s29] sm:$0xff]  ;;  %v285_v27 = vld [vmem:[%s275_s29 + $0x8] sm:$0xff]  ;;  %v1071_v28 = vld [vmem:[%s1398_s3 + $0x30] ss:$8 sps:$4 sm:$0xff]   ;;  %v306_v63 = vshrl.u32 %v305_v62, 7  ;;  %vm868_vm0 = vcmask 64512  }
  0x16   : > { %400 = vmatpush1.bf16.msra.mxu0 %v1041_v6  ;;  %651 = vmatpush1.bf16.msra.mxu1 %v1062_v14  ;;  %v1072_v29 = vld [vmem:[%s1398_s3 + $0x24] ss:$8 sps:$4 sm:$0xff]   ;;  %v1074_v30 = vld [vmem:[%s1398_s3 + $0x20] ss:$8 sps:$4 sm:$0xff]   ;;  %v286_v31 = vpack.c.bf16 %v285_v27, %v284_v26  ;;  %v1075_v32 = vld [vmem:[%s1398_s3 + $0x14] ss:$8 sps:$4 sm:$0xff]  }
  0x17   : > { %401 = vmatprep.subr.bf16.mxu0 %v1042_v7  ;;  %652 = vmatprep.subr.bf16.mxu1 %v1063_v16  ;;  %v1077_v33 = vld [vmem:[%s1398_s3 + $0x10] ss:$8 sps:$4 sm:$0xff]   ;;  %v1078_v34 = vld [vmem:[%s1398_s3 + $0x4] ss:$8 sps:$4 sm:$0xff]   ;;  %v1080_v35 = vld [vmem:[%s1398_s3] ss:$8 sps:$4 sm:$0xff]  }
  0x18   : > { %v1081_v36 = vld [vmem:[%s1398_s3 + $0xf4] ss:$8 sps:$4 sm:$0xff]   ;;  %v1083_v37 = vld [vmem:[%s1398_s3 + $0xf0] ss:$8 sps:$4 sm:$0xff]   ;;  %v1084_v38 = vld [vmem:[%s1398_s3 + $0xe4] ss:$8 sps:$4 sm:$0xff]  }
  0x19   : > { %v1086_v39 = vld [vmem:[%s1398_s3 + $0xe0] ss:$8 sps:$4 sm:$0xff]   ;;  %v1087_v40 = vld [vmem:[%s1398_s3 + $0xd4] ss:$8 sps:$4 sm:$0xff]   ;;  %v1089_v41 = vld [vmem:[%s1398_s3 + $0xd0] ss:$8 sps:$4 sm:$0xff]  }
  0x1a   : > { %402 = vmatpush1.bf16.msra.mxu0 %v1044_v8  ;;  %653 = vmatpush1.bf16.msra.mxu1 %v1065_v18  ;;  %v1090_v42 = vld [vmem:[%s1398_s3 + $0xc4] ss:$8 sps:$4 sm:$0xff]   ;;  %v1092_v43 = vld [vmem:[%s1398_s3 + $0xc0] ss:$8 sps:$4 sm:$0xff]   ;;  %v1093_v44 = vld [vmem:[%s1398_s3 + $0xb4] ss:$8 sps:$4 sm:$0xff]  }
  0x1b   : > { %403 = vmatprep.subr.bf16.mxu0 %v1045_v9  ;;  %654 = vmatprep.subr.bf16.mxu1 %v1066_v20  ;;  %v1095_v45 = vld [vmem:[%s1398_s3 + $0xb0] ss:$8 sps:$4 sm:$0xff]   ;;  %v1096_v46 = vld [vmem:[%s1398_s3 + $0xa4] ss:$8 sps:$4 sm:$0xff]   ;;  %v1098_v47 = vld [vmem:[%s1398_s3 + $0xa0] ss:$8 sps:$4 sm:$0xff]  }
  0x1c   : > { %v1099_v48 = vld [vmem:[%s1398_s3 + $0x94] ss:$8 sps:$4 sm:$0xff]   ;;  %v1101_v49 = vld [vmem:[%s1398_s3 + $0x90] ss:$8 sps:$4 sm:$0xff]   ;;  %v1102_v50 = vld [vmem:[%s1398_s3 + $0x84] ss:$8 sps:$4 sm:$0xff]  }
  0x1d   : > { %v1104_v51 = vld [vmem:[%s1398_s3 + $0x80] ss:$8 sps:$4 sm:$0xff]   ;;  %v1105_v52 = vld [vmem:[%s1400_s5 + $0x78] sm:$0xff]   ;;  %v1107_v54 = vld [vmem:[%s1400_s5 + $0x70] sm:$0xff]   ;;  %v311_v0 = vsub.s32 1, %v306_v63  ;;  %v307_v1 = vsub.s32 0, %v306_v63 }
  0x1e   : > { %404 = vmatpush1.bf16.msra.mxu0 %v1047_v13  ;;  %655 = vmatpush1.bf16.msra.mxu1 %v1068_v22  ;;  %v1106_v53 = vld [vmem:[%s1400_s5 + $0x38] sm:$0xff]   ;;  %v1108_v55 = vld [vmem:[%s1400_s5 + $0x30] sm:$0xff]   ;;  %v1110_v57 = vld [vmem:[%s1400_s5 + $0x28] sm:$0xff]  }
  0x1f   : > { %405 = vmatprep.subr.bf16.mxu0 %v1048_v15  ;;  %656 = vmatprep.subr.bf16.mxu1 %v1069_v24  ;;  %v1111_v58 = vld [vmem:[%s1400_s5 + $0x60] sm:$0xff]   ;;  %v1113_v60 = vld [vmem:[%s1400_s5 + $0x58] sm:$0xff]   ;;  %v1116_v20 = vld [vmem:[%s1400_s5 + $0x10] sm:$0xff]  }
  0x20   : > { %v1112_v59 = vld [vmem:[%s1400_s5 + $0x20] sm:$0xff]   ;;  %v1114_v61 = vld [vmem:[%s1400_s5 + $0x18] sm:$0xff]   ;;  %v1118_v22 = vld [vmem:[%s1400_s5 + $0x8] sm:$0xff]  }
  0x21   : > { %v303_v2 = vld [vmem:[%s1397_s2] sm:$0x3] }
  0x22   : > { %406 = vmatpush1.bf16.msra.mxu0 %v1050_v17  ;;  %657 = vmatpush1.bf16.msra.mxu1 %v1071_v28  ;;  %v312_v4 = vrot.slane %v303_v2, %v311_v0  ;;  %v308_v5 = vrot.slane %v303_v2, %v307_v1  ;;  %v1120_v24 = vld [vmem:[%s1400_s5] sm:$0xff]  }
  0x23   : > { %407 = vmatprep.subr.bf16.mxu0 %v1051_v19  ;;  %658 = vmatprep.subr.bf16.mxu1 %v1072_v29  ;;  %v1115_v19 = vld [vmem:[%s1400_s5 + $0x50] sm:$0xff]  }
  0x26   : > { %408 = vmatpush1.bf16.msra.mxu0 %v1053_v21  ;;  %659 = vmatpush1.bf16.msra.mxu1 %v1074_v30  ;;  %v1117_v21 = vld [vmem:[%s1400_s5 + $0x48] sm:$0xff]  }
  0x27   : > { %409 = vmatprep.subr.bf16.mxu0 %v1054_v23  ;;  %660 = vmatprep.subr.bf16.mxu1 %v1075_v32  ;;  %v1119_v23 = vld [vmem:[%s1400_s5 + $0x40] sm:$0xff]  }
  0x2a   : > { %410 = vmatpush1.bf16.msra.mxu0 %v1056_v25  ;;  %661 = vmatpush1.bf16.msra.mxu1 %v1077_v33  ;;  %v476_v25 = vld [vmem:[%s1399_s4] sm:$0x3] }
  0x2b   : > { %662 = vmatprep.subr.bf16.mxu1 %v1078_v34  ;;  %1002 = vmatprep.subr.bf16.mxu0 %v1105_v52  ;;  %v485_v27 = vrot.slane %v476_v25, %v311_v0  ;;  %v481_v28 = vrot.slane %v476_v25, %v307_v1 }
  0x2d   : > { %428 = vmatmul.mubr.bf16.vlgmr.msra.gmra.mxu0 %v286_v31 }
  0x2e   : > { %663 = vmatpush1.bf16.msra.mxu1 %v1080_v35  ;;  %1003 = vmatpush3.bf16.msra.mxu0 %v1106_v53 }
  0x2f   : > { %664 = vmatprep.subr.bf16.mxu1 %v1081_v36  ;;  %1004 = vmatprep.subr.bf16.mxu0 %v1107_v54 }
  0x32   : > { %665 = vmatpush2.bf16.msra.mxu1 %v1083_v37  ;;  %1005 = vmatpush3.bf16.msra.mxu0 %v1108_v55 }
  0x33   : > { %666 = vmatprep.subr.bf16.mxu1 %v1084_v38  ;;  %1006 = vmatprep.subr.bf16.mxu0 %v1109_v56 }
  0x36   : > { %667 = vmatpush2.bf16.msra.mxu1 %v1086_v39  ;;  %1007 = vmatpush3.bf16.msra.mxu0 %v1110_v57 }
  0x37   : > { %668 = vmatprep.subr.bf16.mxu1 %v1087_v40  ;;  %1008 = vmatprep.subr.bf16.mxu0 %v1111_v58 }
  0x3a   : > { %669 = vmatpush2.bf16.msra.mxu1 %v1089_v41  ;;  %1009 = vmatpush3.bf16.msra.mxu0 %v1112_v59 }
  0x3b   : > { %670 = vmatprep.subr.bf16.mxu1 %v1090_v42  ;;  %1010 = vmatprep.subr.bf16.mxu0 %v1113_v60 }
  0x3e   : > { %671 = vmatpush2.bf16.msra.mxu1 %v1092_v43  ;;  %1011 = vmatpush3.bf16.msra.mxu0 %v1114_v61  ;;  %v730_v43 = vstv %s729_s12 }
  0x3f   : > { %672 = vmatprep.subr.bf16.mxu1 %v1093_v44  ;;  %1012 = vmatprep.subr.bf16.mxu0 %v1115_v19 }
  0x42   : > { %673 = vmatpush2.bf16.msra.mxu1 %v1095_v45  ;;  %1013 = vmatpush3.bf16.msra.mxu0 %v1116_v20 }
  0x43   : > { %674 = vmatprep.subr.bf16.mxu1 %v1096_v46  ;;  %1014 = vmatprep.subr.bf16.mxu0 %v1117_v21 }
  0x46   : > { %675 = vmatpush2.bf16.msra.mxu1 %v1098_v47  ;;  %1015 = vmatpush3.bf16.msra.mxu0 %v1118_v22 }
  0x47   : > { %676 = vmatprep.subr.bf16.mxu1 %v1099_v48  ;;  %1016 = vmatprep.subr.bf16.mxu0 %v1119_v23 }
  0x4a   : > { %677 = vmatpush2.bf16.msra.mxu1 %v1101_v49  ;;  %1017 = vmatpush3.bf16.msra.mxu0 %v1120_v24 }
  0x4b   : > { %678 = vmatprep.subr.bf16.mxu1 %v1102_v50 }
  0x4e   : > { %679 = vmatpush2.bf16.msra.mxu1 %v1104_v51 }
  0xed   : > { %v429_v3 = vpop.f32.mrf.mxu0 }
  0xee   : > { %v430_v10 = vadd.f32 %v429_v3, %v308_v5 }
  0xef   : > { %v431_v6 = vpop.f32.mrf.mxu0 }
  0xf0   : > { %v432_v8 = vadd.f32 %v431_v6, %v312_v4  ;;  %v438_v16 = vmax.f32 %v430_v10, 0.0 }
  0xf1   : > { %v433_v7 = vpop.f32.mrf.mxu0 }
  0xf2   : > { %v434_v9 = vadd.f32 %v433_v7, %v308_v5  ;;  %v439_v14 = vmax.f32 %v432_v8, 0.0 }
  0xf3   : > { %v435_v11 = vpop.f32.mrf.mxu0 }
  0xf4   : > { %v436_v12 = vadd.f32 %v435_v11, %v312_v4  ;;  %v440_v13 = vmax.f32 %v434_v9, 0.0 }
  0xf6   : > { %v441_v15 = vmax.f32 %v436_v12, 0.0  ;;  %v442_v18 = vpack.c.bf16 %v440_v13, %v438_v16 }
  0xf8   : > { %v443_v17 = vpack.c.bf16 %v441_v15, %v439_v14 }
  0xfa   : > { %680 = vmatprep.mubr.bf16.mxu1 %v443_v17 }
  0xfb   : > { %681 = vmatmul.mubr.bf16.vlgmr.msra.gmra.mxu1 %v442_v18 }
 0x1bb   : > { %v682_v26 = vpop.f32.mrf.mxu1 }
 0x1bc   : > { %v683_v33 = vadd.f32 %v682_v26, %v481_v28 }
 0x1bd   : > { %v684_v29 = vpop.f32.mrf.mxu1 }
 0x1be   : > { %v685_v31 = vadd.f32 %v684_v29, %v485_v27  ;;  %v691_v39 = vmax.f32 %v683_v33, 0.0 }
 0x1bf   : > { %v686_v30 = vpop.f32.mrf.mxu1 }
 0x1c0   : > { %v687_v32 = vadd.f32 %v686_v30, %v481_v28  ;;  %v692_v37 = vmax.f32 %v685_v31, 0.0 }
 0x1c1   : > { %v688_v34 = vpop.f32.mrf.mxu1 }
 0x1c2   : > { %v689_v35 = vadd.f32 %v688_v34, %v485_v27  ;;  %v693_v36 = vmax.f32 %v687_v32, 0.0 }
 0x1c4   : > { %v694_v38 = vmax.f32 %v689_v35, 0.0  ;;  %v695_v41 = vpack.c.bf16 %v693_v36, %v691_v39 }
 0x1c6   : > { %v696_v40 = vpack.c.bf16 %v694_v38, %v692_v37 }
 0x1c8   : > { %859 = vmatprep.mubr.bf16.mxu0 %v696_v40 }
 0x1c9   : > { %860 = vmatmul.mubr.bf16.vlgmr.msra.gmra.mxu0 %v695_v41 }
 0x289   : > { %v1018_v42 = vpop.f32.mrf.mxu0 }
 0x28b   : > { %v1019_v44 = vpop.f32.mrf.mxu0 }
 0x28c   : > { %v1020_v45 = vadd.f32 %v1019_v44, %v1018_v42 }
 0x28d   : > { %v1021_v46 = vpop.f32.mrf.mxu0 }
 0x28e   : > { %v862_v47 = vadd.f32 %v1020_v45, %v730_v43 }
 0x28f   : > { %v1022_v48 = vpop.f32.mrf.mxu0 }
 0x290   : > { %869 = vst.msk [vmem:[%s281_s15] sm:$0xff] %vm868_vm0, %v862_v47  ;;  %v1023_v49 = vadd.f32 %v1022_v48, %v1021_v46 }
 0x292   : > { %v865_v50 = vadd.f32 %v1023_v49, %v730_v43 }
 0x294   : > { %870 = vst.msk [vmem:[%s281_s15 + $0x8] sm:$0xff] %vm868_vm0, %v865_v50 }
 0x295 PF: > { %s18_s26 = sadd.s32 1, %s1127_s26  }
 0x296   : > { %p15_p4 = scmp.ge.s32.totalorder %s18_s26, 4  }
 0x298   :  { %17 = sbr.rel (!%p15_p4) target bundleno = 2 (0x2), region = 78 }

</bundles_post_ra>
